<compile_context>
chip_gen: v7x
topology: tpu7x:2x2x1
jax: 0.10.0
libtpu: 0.0.40
codegen_flags: <defaults>
</compile_context>

<pallas_src>
import functools

import jax
import jax.numpy as jnp
from jax.experimental import pallas as pl
from jax.experimental.pallas import tpu as pltpu

EMBED_SIZE = 5

# Synthetic Z_maps analogue (baked as Python constants, closed over by the kernel):
#   "cat"  feature with C categories -> CatKnockout(C, EMBED_SIZE):
#             embedding table of (C + 1) rows, knockout index Z0 = C.
#   "cont" feature -> ContKnockoutBounded(amin, amax):
#             (x - amin)/(amax - amin), NaN -> -1.
FEATURES = (
    {"kind": "cat", "num_categories": 7},            # codes 0..6, table 8 x 5, Z0=7
    {"kind": "cont", "amin": 0.0, "amax": 2.0},
    {"kind": "cat", "num_categories": 4},            # codes 0..3, table 5 x 5, Z0=4
    {"kind": "cont", "amin": 0.0, "amax": 1.0},      # default (0, 1) bounds
)
OUT_SIZE = sum(EMBED_SIZE if s["kind"] == "cat" else 1 for s in FEATURES)
N_CAT = sum(1 for s in FEATURES if s["kind"] == "cat")

# TODO(synk): training-time bernoulli knockout (p_knockout > 0) is a train-only
# path; this kernel implements the eval forward pass.


def _embednet_kernel(z_ref, tab_ref, o_ref, *, tn, v_pad, n_cat):
    """One grid step processes a (tn, F) batch tile.

    All categorical features share ONE fused one-hot (tn, n_cat*v_pad) and ONE
    MXU matmul against the block-diagonal table (NaN -> knockout row Z0).
    Continuous features are normalized on the VPU (NaN -> -1).  A single
    concatenated store writes the whole (tn, OUT_SIZE) tile.
    """
    z = z_ref[...]                                        # (tn, F) f32

    # Shared iota for the fused one-hot (hoisted out of the feature loop).
    iota = jax.lax.broadcasted_iota(jnp.int32, (tn, n_cat * v_pad), 1)

    onehot_masks = []
    cont_vals = []
    cat_j = 0
    for i, spec in enumerate(FEATURES):
        zi = z[:, i:i + 1]                                # (tn, 1)
        if spec["kind"] == "cat":
            z0 = float(spec["num_categories"])            # knockout index
            idx = jnp.where(jnp.isnan(zi), jnp.float32(z0), zi).astype(jnp.int32)
            # Target column lies inside this feature's v_pad block, so the
            # per-feature masks are disjoint and can simply be OR-ed.
            onehot_masks.append(iota == (idx + cat_j * v_pad))
            cat_j += 1
        else:
            amin = float(spec["amin"])
            amax = float(spec["amax"])
            scale = 1.0 / (amax - amin)
            cont_vals.append(
                jnp.where(jnp.isnan(zi), jnp.float32(-1.0), (zi - amin) * scale))

    mask = onehot_masks[0]
    for m in onehot_masks[1:]:
        mask = mask | m
    onehot = mask.astype(jnp.float32)                     # (tn, n_cat*v_pad)

    # Single fused lookup: block-diagonal table keeps per-feature blocks disjoint.
    emb_all = jnp.dot(onehot, tab_ref[...],
                      preferred_element_type=jnp.float32)  # (tn, n_cat*E)

    # Reassemble outputs in module order; one concat, one store.
    parts = []
    cat_j = 0
    cont_j = 0
    for spec in FEATURES:
        if spec["kind"] == "cat":
            parts.append(emb_all[:, cat_j * EMBED_SIZE:(cat_j + 1) * EMBED_SIZE])
            cat_j += 1
        else:
            parts.append(cont_vals[cont_j])
            cont_j += 1
    o_ref[...] = jnp.concatenate(parts, axis=-1)          # (tn, OUT_SIZE)


def make_params(key):
    """Deterministic N(0,1) embedding tables (nn.Embedding default init),
    padded along the vocab dim to a common multiple-of-8 size and stacked."""
    tables = []
    for spec in FEATURES:
        if spec["kind"] == "cat":
            key, sub = jax.random.split(key)
            rows = spec["num_categories"] + 1             # +1 knockout row (Z0)
            tables.append(jax.random.normal(sub, (rows, EMBED_SIZE), jnp.float32))
    v_pad = max(t.shape[0] for t in tables)
    v_pad = ((v_pad + 7) // 8) * 8
    padded = [jnp.pad(t, ((0, v_pad - t.shape[0]), (0, 0))) for t in tables]
    return jnp.stack(padded, axis=0)                      # (n_cat, v_pad, E)


def make_fused_table(tables):
    """Block-diagonal fused table (n_cat*v_pad, n_cat*E) so all categorical
    lookups become a single one-hot matmul.  Built once, outside the kernel."""
    n_cat, v_pad, e = tables.shape
    fused = jnp.zeros((n_cat * v_pad, n_cat * e), jnp.float32)
    for j in range(n_cat):
        fused = fused.at[j * v_pad:(j + 1) * v_pad, j * e:(j + 1) * e].set(tables[j])
    return fused


def embednet_forward(z_vec, fused_table, *, tn=1024):
    if z_vec.ndim == 1:
        z_vec = z_vec[:, None]
    n, f = z_vec.shape
    assert f == len(FEATURES)

    n_cat = N_CAT
    v_pad = fused_table.shape[0] // n_cat
    assert fused_table.shape == (n_cat * v_pad, n_cat * EMBED_SIZE)

    # Cap the tile to the (8-aligned) batch so small inputs don't over-pad;
    # at large N the default tn=1024 keeps per-step overhead negligible and
    # leaves >=2 grid steps so "parallel" can shard across TensorCores.
    tn = max(8, min(tn, ((n + 7) // 8) * 8))
    n_pad = ((n + tn - 1) // tn) * tn
    if n_pad != n:
        z_vec = jnp.pad(z_vec, ((0, n_pad - n), (0, 0)))

    kernel = functools.partial(_embednet_kernel, tn=tn, v_pad=v_pad, n_cat=n_cat)
    out = pl.pallas_call(
        kernel,
        out_shape=jax.ShapeDtypeStruct((n_pad, OUT_SIZE), jnp.float32),
        grid=(n_pad // tn,),
        in_specs=[
            pl.BlockSpec((tn, f), lambda i: (i, 0)),            # batch tile of Z_vec
            pl.BlockSpec(fused_table.shape, lambda i: (0, 0)),  # table resident (grid-invariant)
        ],
        out_specs=pl.BlockSpec((tn, OUT_SIZE), lambda i: (i, 0)),
        compiler_params=pltpu.CompilerParams(
            dimension_semantics=("parallel",)),
    )(z_vec, fused_table)
    return out[:n]


def embednet_reference(z_vec, tables):
    """Pure-JAX reference mirroring the PyTorch forward."""
    if z_vec.ndim == 1:
        z_vec = z_vec[:, None]
    outs = []
    cat_i = 0
    for i, spec in enumerate(FEATURES):
        zi = z_vec[:, i]
        if spec["kind"] == "cat":
            z0 = float(spec["num_categories"])
            idx = jnp.where(jnp.isnan(zi), z0, zi).astype(jnp.int32)
            outs.append(tables[cat_i][idx])
            cat_i += 1
        else:
            amin, amax = float(spec["amin"]), float(spec["amax"])
            outs.append(
                jnp.where(jnp.isnan(zi), -1.0, (zi - amin) / (amax - amin))[:, None])
    return jnp.concatenate(outs, axis=-1)


if __name__ == "__main__":
    key = jax.random.PRNGKey(0)
    key, k_tab, k_cat0, k_cat1, k_c0, k_c1, k_nan = jax.random.split(key, 7)

    tables = make_params(k_tab)                 # (n_cat, v_pad, E) for the reference
    fused_table = make_fused_table(tables)      # block-diagonal for the kernel

    n = 16
    # Build a (N, 4) float Z_vec with some NaN knockouts per column.
    col_cat0 = jax.random.randint(k_cat0, (n,), 0, 7).astype(jnp.float32)
    col_cont0 = jax.random.uniform(k_c0, (n,), minval=0.0, maxval=2.0)
    col_cat1 = jax.random.randint(k_cat1, (n,), 0, 4).astype(jnp.float32)
    col_cont1 = jax.random.uniform(k_c1, (n,), minval=0.0, maxval=1.0)
    z_vec = jnp.stack([col_cat0, col_cont0, col_cat1, col_cont1], axis=-1)
    nan_mask = jax.random.bernoulli(k_nan, 0.25, z_vec.shape)
    z_vec = jnp.where(nan_mask, jnp.nan, z_vec)

    out = embednet_forward(z_vec, fused_table)
    out = jax.block_until_ready(out)

    ref = embednet_reference(z_vec, tables)
    assert out.shape == (n, OUT_SIZE), out.shape
    assert jnp.allclose(out, ref, atol=1e-6, rtol=1e-6), (
        "mismatch vs reference: max abs err = %s" % jnp.max(jnp.abs(out - ref)))

    print("KERNEL_OK")
</pallas_src>

<mosaic_0001>
module attributes {stable_mosaic.version = 11 : i64} {
  func.func @_embednet_kernel(%arg0: i32, %arg1: memref<16x4xf32, #tpu.memory_space<vmem>>, %arg2: memref<16x10xf32, #tpu.memory_space<vmem>>, %arg3: memref<16x12xf32, #tpu.memory_space<vmem>>) attributes {dimension_semantics = [#tpu.dimension_semantics<parallel>], iteration_bounds = array<i64: 1>, scalar_prefetch = 0 : i64, scratch_operands = 0 : i64, tpu.core_type = #tpu.core_type<tc>, window_params = [{transform_indices = @transform_0, window_bounds = array<i64: 16, 4>}, {pipeline_mode = #tpu.pipeline_mode<synchronous>, transform_indices = @transform_1, window_bounds = array<i64: 16, 10>}, {transform_indices = @transform_2, window_bounds = array<i64: 16, 12>}]} {
    %c0 = arith.constant 0 : index
    %c0_0 = arith.constant 0 : index
    %0 = vector.load %arg1[%c0, %c0_0] : memref<16x4xf32, #tpu.memory_space<vmem>>, vector<16x4xf32>
    %1 = tpu.iota {dimensions = array<i32: 1>} : vector<16x16xi32>
    %2 = vector.extract_strided_slice %0 {offsets = [0, 0], sizes = [16, 1], strides = [1, 1]} : vector<16x4xf32> to vector<16x1xf32>
    %3 = arith.cmpf one, %2, %2 : vector<16x1xf32>
    %cst = arith.constant 7.000000e+00 : f32
    %4 = vector.broadcast %cst : f32 to vector<16x1xf32>
    %5 = arith.select %3, %4, %2 : vector<16x1xi1>, vector<16x1xf32>
    %6 = arith.fptosi %5 : vector<16x1xf32> to vector<16x1xi32>
    %c0_i32 = arith.constant 0 : i32
    %7 = vector.broadcast %c0_i32 : i32 to vector<16x1xi32>
    %8 = arith.addi %6, %7 : vector<16x1xi32>
    %9 = vector.broadcast %8 : vector<16x1xi32> to vector<16x16xi32>
    %10 = arith.cmpi eq, %1, %9 : vector<16x16xi32>
    %11 = vector.extract_strided_slice %0 {offsets = [0, 1], sizes = [16, 1], strides = [1, 1]} : vector<16x4xf32> to vector<16x1xf32>
    %12 = arith.cmpf one, %11, %11 : vector<16x1xf32>
    %cst_1 = arith.constant 0.000000e+00 : f32
    %13 = vector.broadcast %cst_1 : f32 to vector<16x1xf32>
    %14 = arith.subf %11, %13 : vector<16x1xf32>
    %cst_2 = arith.constant 5.000000e-01 : f32
    %15 = vector.broadcast %cst_2 : f32 to vector<16x1xf32>
    %16 = arith.mulf %14, %15 : vector<16x1xf32>
    %cst_3 = arith.constant -1.000000e+00 : f32
    %17 = vector.broadcast %cst_3 : f32 to vector<16x1xf32>
    %18 = arith.select %12, %17, %16 : vector<16x1xi1>, vector<16x1xf32>
    %19 = vector.extract_strided_slice %0 {offsets = [0, 2], sizes = [16, 1], strides = [1, 1]} : vector<16x4xf32> to vector<16x1xf32>
    %20 = arith.cmpf one, %19, %19 : vector<16x1xf32>
    %cst_4 = arith.constant 4.000000e+00 : f32
    %21 = vector.broadcast %cst_4 : f32 to vector<16x1xf32>
    %22 = arith.select %20, %21, %19 : vector<16x1xi1>, vector<16x1xf32>
    %23 = arith.fptosi %22 : vector<16x1xf32> to vector<16x1xi32>
    %c8_i32 = arith.constant 8 : i32
    %24 = vector.broadcast %c8_i32 : i32 to vector<16x1xi32>
    %25 = arith.addi %23, %24 : vector<16x1xi32>
    %26 = vector.broadcast %25 : vector<16x1xi32> to vector<16x16xi32>
    %27 = arith.cmpi eq, %1, %26 : vector<16x16xi32>
    %28 = vector.extract_strided_slice %0 {offsets = [0, 3], sizes = [16, 1], strides = [1, 1]} : vector<16x4xf32> to vector<16x1xf32>
    %29 = arith.cmpf one, %28, %28 : vector<16x1xf32>
    %cst_5 = arith.constant 0.000000e+00 : f32
    %30 = vector.broadcast %cst_5 : f32 to vector<16x1xf32>
    %31 = arith.subf %28, %30 : vector<16x1xf32>
    %cst_6 = arith.constant 1.000000e+00 : f32
    %32 = vector.broadcast %cst_6 : f32 to vector<16x1xf32>
    %33 = arith.mulf %31, %32 : vector<16x1xf32>
    %cst_7 = arith.constant -1.000000e+00 : f32
    %34 = vector.broadcast %cst_7 : f32 to vector<16x1xf32>
    %35 = arith.select %29, %34, %33 : vector<16x1xi1>, vector<16x1xf32>
    %36 = arith.ori %10, %27 : vector<16x16xi1>
    %37 = arith.extui %36 : vector<16x16xi1> to vector<16x16xi32>
    %38 = arith.sitofp %37 : vector<16x16xi32> to vector<16x16xf32>
    %c0_8 = arith.constant 0 : index
    %c0_9 = arith.constant 0 : index
    %39 = vector.load %arg2[%c0_8, %c0_9] : memref<16x10xf32, #tpu.memory_space<vmem>>, vector<16x10xf32>
    %cst_10 = arith.constant dense<0.000000e+00> : vector<16x10xf32>
    %40 = tpu.matmul %38, %39, %cst_10 {dimension_numbers = #tpu.dot_dimension_numbers<[1], [0], [0], [1], [0, 0, 1, 1], [], []>} : vector<16x16xf32>, vector<16x10xf32>, vector<16x10xf32> -> vector<16x10xf32>
    %41 = vector.extract_strided_slice %40 {offsets = [0, 0], sizes = [16, 5], strides = [1, 1]} : vector<16x10xf32> to vector<16x5xf32>
    %42 = vector.extract_strided_slice %40 {offsets = [0, 5], sizes = [16, 5], strides = [1, 1]} : vector<16x10xf32> to vector<16x5xf32>
    %43 = tpu.concatenate %41, %18, %42, %35 in 1 : vector<16x5xf32>, vector<16x1xf32>, vector<16x5xf32>, vector<16x1xf32> -> vector<16x12xf32>
    %c0_11 = arith.constant 0 : index
    %c0_12 = arith.constant 0 : index
    %44 = vector.load %arg3[%c0_11, %c0_12] : memref<16x12xf32, #tpu.memory_space<vmem>>, vector<16x12xf32>
    tpu.vector_store %arg3[%c0_11, %c0_12], %43 {strides = array<i32>} : memref<16x12xf32, #tpu.memory_space<vmem>>, vector<16x12xf32>,
    return
  }
  func.func @transform_0(%arg0: i32) -> (i32, i32) {
    %c0_i32 = arith.constant 0 : i32
    %c0_i32_0 = arith.constant 0 : i32
    return %arg0, %c0_i32 : i32, i32
  }
  func.func @transform_1(%arg0: i32) -> (i32, i32) {
    %c0_i32 = arith.constant 0 : i32
    %c0_i32_0 = arith.constant 0 : i32
    %c0_i32_1 = arith.constant 0 : i32
    return %c0_i32, %c0_i32_0 : i32, i32
  }
  func.func @transform_2(%arg0: i32) -> (i32, i32) {
    %c0_i32 = arith.constant 0 : i32
    %c0_i32_0 = arith.constant 0 : i32
    return %arg0, %c0_i32 : i32, i32
  }
}

</mosaic_0001>

<bundles_post_ra>
// kernel: tpu_custom_call.1
= control target key start
LH: loop header
LB: loop body
LE: loop exit
PB: predicated region body
PF: predicated region fallthrough
CT: control target
= control target key end

     0   :  { %s345_s0 = inlined_call_operand.vmem [shape: f32[16,4], index: 0, kind: input, shape index: {}]   ;;  %s346_s1 = inlined_call_operand.vmem [shape: f32[16,10], index: 1, kind: input, shape index: {}]   ;;  %s347_s2 = inlined_call_operand.hbm [shape: f32[16,12], index: 2, kind: output, shape index: {}]  }
   0x1   :  { %v281_v0 = vld [vmem:[%s345_s0 + $0x8] sm:$0xff]  ;;  %v286_v1 = vld [vmem:[%s345_s0] sm:$0xff] }
   0x2   :  { %7 = vsyncpa [#allocation3], 0  ;;  %v255_v2 = vmov 0   ;;  %vm17_vm0 = vcmp.ne.f32.partialorder %v281_v0, %v281_v0  ;;  %vm16_vm1 = vcmp.ne.f32.partialorder %v286_v1, %v286_v1  ;;  %v56_v17 = vld [vmem:[%s346_s1] sm:$0xff]  ;;  %v57_v18 = vld [vmem:[%s346_s1 + $0x8] sm:$0xff]  ;;  %v256_v20 = vmov 2  }
   0x3   :  { %229 = vset.pattern.permute.xlu1 %v255_v2  ;;  %227 = vset.pattern.permute.xlu0 %v255_v2  ;;  %v19_v3 = vsel %vm17_vm0, 7.0, %v281_v0  ;;  %v18_v4 = vsel %vm16_vm1, 7.0, %v286_v1  ;;  %v35_v5 = vsel %vm17_vm0, 4.0, %v281_v0  ;;  %v34_v6 = vsel %vm16_vm1, 4.0, %v286_v1  ;;  %s257_s1 = smov 4   ;;  %s259_s16 = smov 1  }
   0x4   :  { %v213_v7 = vtrunc.f32 %v19_v3  ;;  %v211_v8 = vtrunc.f32 %v18_v4  ;;  %v217_v9 = vtrunc.f32 %v35_v5  ;;  %v215_v10 = vtrunc.f32 %v34_v6  ;;  %s260_s17 = smov 8   ;;  %s261_s18 = smov [#allocation2]  }
   0x5   :  { %v207_v19 = vpack.c.bf16 %v57_v18, %v56_v17  ;;  %v31_v21 = vmul.f32 0.5, %v281_v0  ;;  %v30_v22 = vmul.f32 0.5, %v286_v1  ;;  %v14_v25 = vlaneseq  ;;  %s181_s19 = sshll.u32 %s261_s18, 4  ;;  %s182_s19 = int_to_ptr.vmem [resolvable:$true] %s181_s19 }
   0x6   :  { %v214_v11 = vcvt.f32.s32 %v213_v7  ;;  %v212_v12 = vcvt.f32.s32 %v211_v8  ;;  %v218_v13 = vcvt.f32.s32 %v217_v9  ;;  %v216_v14 = vcvt.f32.s32 %v215_v10  ;;  %s231_s20 = scalar_lea.vmem %s182_s19, 256  ;;  %p236_p1 = scmp.lt.s32.totalorder %s182_s19, %s182_s19 }
   0x7   :  { %208 = vmatprep.subr.bf16.mxu0 %v207_v19  ;;  %v33_v23 = vsel %vm17_vm0, -1.0, %v31_v21  ;;  %v32_v24 = vsel %vm16_vm1, -1.0, %v30_v22  ;;  %v15_v28 = vand.u32 127, %v14_v25  ;;  %vm58_vm7 = vcmask 130048   ;;  %p232_p0 = scmp.ne.s32.totalorder %s182_s19, %s231_s20  ;;  %p237_p2 = scmp.lt.s32.totalorder %s231_s20, %s231_s20 }
   0x8   :  { %26 = vperm.xlu1 %229, %v214_v11   ;;  %23 = vperm.xlu0 %227, %v212_v12   ;;  %v39_v15 = vadd.s32 8, %v218_v13  ;;  %v38_v16 = vadd.s32 8, %v216_v14  ;;  %v258_v31 = vmov 0.0   ;;  %v49_v36 = vsel %vm17_vm0, -1.0, %v281_v0 }
   0x9   :  { %210 = vmatpush3.bf16.msra.mxu0 %v207_v19  ;;  %v48_v37 = vsel %vm16_vm1, -1.0, %v286_v1  ;;  %vm164_vm9 = vcmask 39936   ;;  %vm167_vm10 = vcmask 48128   ;;  %vm170_vm11 = vcmask 89088   ;;  %p238_p3 = por %p237_p2, %p236_p1 }
   0xa   :  { %vm173_vm12 = vcmask 97280  }
   0xb   :  { %p239_p4 = pnand %p238_p3, %p232_p0 }
   0xc   :  { %230 = vset.pattern.permute.xlu1 %v256_v20  ;;  %228 = vset.pattern.permute.xlu0 %v256_v20 }
   0xd   :  { %44 = vperm.xlu1 %230, %v39_v15   ;;  %41 = vperm.xlu0 %228, %v38_v16  }
  0x11   :  { %144 = vrot.lane.b32.xlu0 %v33_v23, %s257_s1  ;;  %142 = vrot.lane.b32.xlu1 %v32_v24, %s257_s1 }
  0x87   :  { %v24_v26 = vpop.permute.xlu0 %23  ;;  %v27_v27 = vpop.permute.xlu1 %26 }
  0x88   :  { %vm29_vm2 = vcmp.eq.s32.totalorder %v15_v28, %v27_v27  ;;  %vm28_vm5 = vcmp.eq.s32.totalorder %v15_v28, %v24_v26 }
  0x8c   :  { %v45_v29 = vpop.permute.xlu1 %44  ;;  %v42_v30 = vpop.permute.xlu0 %41 }
  0x8d   :  { %vm47_vm3 = vcmp.eq.s32.totalorder %v15_v28, %v45_v29  ;;  %vm46_vm4 = vcmp.eq.s32.totalorder %v15_v28, %v42_v30 }
  0x8e   :  { %vm51_vm6 = vmor %vm29_vm2, %vm47_vm3 }
  0x8f   :  { %vm50_vm8 = vmor %vm28_vm5, %vm46_vm4  ;;  %v193_v32 = vsel %vm51_vm6, 1.0, %v258_v31 }
  0x90   :  { %v192_v33 = vsel %vm50_vm8, 1.0, %v258_v31  ;;  %v145_v38 = vpop.permute.xlu0 %144  ;;  %v143_v39 = vpop.permute.xlu1 %142 }
  0x91   :  { %204 = vmatprep.mubr.msk.f32.mxu0 %vm58_vm7, %v192_v33 }
  0x92   :  { %205 = vmatmul.mubr.msk.f32.vlgmr.msra.gmra.mrb[0].mxu0 %vm58_vm7, %v193_v32 }
 0x165   :  { %v206_v34 = vpop.f32.mrb[0].mxu0 }
 0x166   :  { %152 = vrot.lane.b32.xlu0 %v206_v34, %s259_s16  ;;  %v131_v35 = vpop.f32.mrb[1].mxu0  ;;  %v166_v42 = vsel %vm164_vm9, %v206_v34, %v145_v38 }
 0x167   :  { %150 = vrot.lane.b32.xlu1 %v131_v35, %s259_s16  ;;  %v165_v43 = vsel %vm164_vm9, %v131_v35, %v143_v39 }
 0x16a   :  { %160 = vrot.lane.b32.xlu0 %v49_v36, %s260_s17 }
 0x16b   :  { %158 = vrot.lane.b32.xlu1 %v48_v37, %s260_s17 }
 0x1d8   :  { %v153_v40 = vpop.permute.xlu0 %152 }
 0x1d9   :  { %v151_v41 = vpop.permute.xlu1 %150  ;;  %v169_v44 = vsel %vm167_vm10, %v166_v42, %v153_v40 }
 0x1da   :  { %v168_v46 = vsel %vm167_vm10, %v165_v43, %v151_v41 }
 0x1dc   :  { %v161_v45 = vpop.permute.xlu0 %160 }
 0x1dd   :  { %v172_v47 = vsel %vm170_vm11, %v169_v44, %v161_v45  ;;  %v159_v48 = vpop.permute.xlu1 %158 }
 0x1de   :  { %175 = vst.msk [vmem:[#allocation2 + $0x8] sm:$0xff] %vm173_vm12, %v172_v47  ;;  %v171_v49 = vsel %vm170_vm11, %v168_v46, %v159_v48 }
 0x1df   :  { %174 = vst.msk [vmem:[#allocation2] sm:$0xff] %vm173_vm12, %v171_v49 }
 0x1e0   :  { %242 = shalt.err (!%p239_p4)
}
 0x1e1   :  { %s243_s23 = scalar_lea.hbm %s347_s2, 256 }
 0x1e2   :  { %p244_p5 = scmp.ne.s32.totalorder %s347_s2, %s243_s23  ;;  %p247_p6 = scmp.lt.u32.totalorder %s243_s23, %s347_s2 }
 0x1e4   :  { %p249_p7 = pnand %p247_p6, %p244_p5 }
 0x1e6   :  { %252 = shalt.err (!%p249_p7)
}
 0x1e7   :  { %s262_s28 = smov 128  }
 0x1e8   :  { %187 = dma.vmem_to_hbm [thread:$0]  %s182_s19, 256, %s347_s2, [#allocation3], %s262_s28, %s262_s28, %s260_s17  }
 0x1e9   :  { %253 = dma.done.wait [#allocation3], 256  }
 0x1ea   :  { %254 = vsyncadd [#allocation3], 4294967040 }
 0x1eb   :  { %191 = vsyncpa [#allocation3], 1 }

</bundles_post_ra>
